<compile_context>
chip_gen: v7x
topology: tpu7x:2x2x1
jax: 0.10.0
libtpu: 0.0.40
codegen_flags: <defaults>
</compile_context>

<pallas_src>
import math

import jax
import jax.numpy as jnp
from jax.experimental import pallas as pl
from jax.experimental.pallas import tpu as pltpu


# ----------------------------------------------------------------------------
# Filterbank construction (glue, plain JAX) — mirrors
# torchaudio.functional.melscale_fbanks. Deterministic, no checkpoint load.
# ----------------------------------------------------------------------------
def _hz_to_mel(freq: float, mel_scale: str = "htk") -> float:
    if mel_scale == "htk":
        return 2595.0 * math.log10(1.0 + freq / 700.0)
    # slaney
    f_min, f_sp = 0.0, 200.0 / 3
    mels = (freq - f_min) / f_sp
    min_log_hz = 1000.0
    min_log_mel = (min_log_hz - f_min) / f_sp
    logstep = math.log(6.4) / 27.0
    if freq >= min_log_hz:
        mels = min_log_mel + math.log(freq / min_log_hz) / logstep
    return mels


def _mel_to_hz(mels: jnp.ndarray, mel_scale: str = "htk") -> jnp.ndarray:
    if mel_scale == "htk":
        return 700.0 * (10.0 ** (mels / 2595.0) - 1.0)
    # slaney
    f_min, f_sp = 0.0, 200.0 / 3
    freqs = f_min + f_sp * mels
    min_log_hz = 1000.0
    min_log_mel = (min_log_hz - f_min) / f_sp
    logstep = math.log(6.4) / 27.0
    return jnp.where(
        mels >= min_log_mel,
        min_log_hz * jnp.exp(logstep * (mels - min_log_mel)),
        freqs,
    )


def melscale_fbanks(
    n_freqs: int,
    f_min: float,
    f_max: float,
    n_mels: int,
    sample_rate: int,
    norm=None,
    mel_scale: str = "htk",
) -> jnp.ndarray:
    all_freqs = jnp.linspace(0.0, sample_rate // 2, n_freqs)
    m_min = _hz_to_mel(f_min, mel_scale)
    m_max = _hz_to_mel(f_max, mel_scale)
    m_pts = jnp.linspace(m_min, m_max, n_mels + 2)
    f_pts = _mel_to_hz(m_pts, mel_scale)

    # triangular filterbank
    f_diff = f_pts[1:] - f_pts[:-1]                      # (n_mels + 1,)
    slopes = f_pts[None, :] - all_freqs[:, None]         # (n_freqs, n_mels + 2)
    down_slopes = (-1.0 * slopes[:, :-2]) / f_diff[:-1]  # (n_freqs, n_mels)
    up_slopes = slopes[:, 2:] / f_diff[1:]               # (n_freqs, n_mels)
    fb = jnp.maximum(0.0, jnp.minimum(down_slopes, up_slopes))

    if norm == "slaney":
        enorm = 2.0 / (f_pts[2 : n_mels + 2] - f_pts[:n_mels])
        fb = fb * enorm[None, :]
    return fb.astype(jnp.float32)


# ----------------------------------------------------------------------------
# Pallas kernel: per-(batch, time-tile)  out = relu(W @ mel_tile)
# ----------------------------------------------------------------------------
def _inverse_melscale_kernel(mel_ref, w_ref, out_ref):
    # mel_ref: (M, TILE_T) VMEM, w_ref: (F, M) VMEM (resident), out_ref: (F, TILE_T)
    spec = jnp.dot(w_ref[...], mel_ref[...], preferred_element_type=jnp.float32)
    out_ref[...] = jnp.maximum(spec, 0.0).astype(out_ref.dtype)


def inverse_melscale_pallas(melspec: jnp.ndarray, w: jnp.ndarray, *, tile_t: int = 512) -> jnp.ndarray:
    """melspec: [B, M, T], w: [F, M] (= pinv(fb.T)) -> specgram: [B, F, T]."""
    B, M, T = melspec.shape
    F, M2 = w.shape
    assert M == M2

    # Lane-dense time tiles: pad T up to a multiple of 128, cap tile at tile_t.
    t_pad_128 = pl.cdiv(T, 128) * 128
    tile = min(tile_t, t_pad_128)            # multiple of 128 by construction
    t_pad = pl.cdiv(T, tile) * tile
    if t_pad != T:
        melspec = jnp.pad(melspec, ((0, 0), (0, 0), (0, t_pad - T)))

    grid = (B, t_pad // tile)

    cost = pl.CostEstimate(
        flops=2 * B * F * M * t_pad,
        transcendentals=0,
        bytes_accessed=4 * (B * M * t_pad + F * M + B * F * t_pad),
    )

    out = pl.pallas_call(
        _inverse_melscale_kernel,
        out_shape=jax.ShapeDtypeStruct((B, F, t_pad), melspec.dtype),
        grid_spec=pltpu.PrefetchScalarGridSpec(
            num_scalar_prefetch=0,
            grid=grid,
            in_specs=[
                # melspec tile: squeeze batch dim, tile time axis
                pl.BlockSpec((pl.Squeezed(), M, tile), lambda b, t: (b, 0, t)),
                # W: constant index_map -> DMA'd once and held resident in VMEM
                pl.BlockSpec((F, M), lambda b, t: (0, 0)),
            ],
            out_specs=pl.BlockSpec((pl.Squeezed(), F, tile), lambda b, t: (b, 0, t)),
        ),
        compiler_params=pltpu.CompilerParams(
            dimension_semantics=("parallel", "parallel"),
        ),
        cost_estimate=cost,
    )(melspec, w)

    if t_pad != T:
        out = out[:, :, :T]
    return out


class InverseMelScale:
    """JAX/Pallas port of torchaudio.transforms.InverseMelScale.

    For a constant, full-(row-)rank A = fb.T the "gels" lstsq solution is the
    minimum-norm solution pinv(fb.T) @ melspec, so W = pinv(fb.T) is
    precomputed once; the batched matmul + relu runs in the Pallas kernel.
    """

    def __init__(
        self,
        n_stft: int,
        n_mels: int = 128,
        sample_rate: int = 16000,
        f_min: float = 0.0,
        f_max=None,
        norm=None,
        mel_scale: str = "htk",
        driver: str = "gels",
        tile_t: int = 512,
    ):
        self.n_mels = n_mels
        self.sample_rate = sample_rate
        self.f_max = f_max if f_max is not None else float(sample_rate // 2)
        self.f_min = f_min
        self.driver = driver
        self.tile_t = tile_t
        if f_min > self.f_max:
            raise ValueError(f"Require f_min: {f_min} <= f_max: {self.f_max}")
        if driver not in ["gels", "gelsy", "gelsd", "gelss"]:
            raise ValueError(
                f'driver must be one of ["gels", "gelsy", "gelsd", "gelss"]. Found {driver}.'
            )
        self.fb = melscale_fbanks(
            n_stft, self.f_min, self.f_max, n_mels, sample_rate, norm, mel_scale
        )  # (n_stft, n_mels)
        # TODO(synk): the least-squares solve itself (tiny, data-independent dense
        # pseudo-inverse of the fixed filterbank) is done once in plain JAX at init,
        # not in Pallas; only the per-sample matmul + relu runs in the kernel.
        self.w = jnp.linalg.pinv(self.fb.T).astype(jnp.float32)  # (n_stft, n_mels)

    def __call__(self, melspec: jnp.ndarray) -> jnp.ndarray:
        # melspec: (..., n_mels, T) -> specgram: (..., n_stft, T)
        lead = melspec.shape[:-2]
        M, T = melspec.shape[-2:]
        if M != self.n_mels:
            raise ValueError(
                "Expected an input with {} mel bins. Found: {}".format(self.n_mels, M)
            )
        mel3 = melspec.reshape((-1, M, T))
        out3 = inverse_melscale_pallas(
            mel3, self.w.astype(melspec.dtype), tile_t=self.tile_t
        )
        F = self.fb.shape[0]
        return out3.reshape(lead + (F, T))


if __name__ == "__main__":
    # Small, deterministic example: batch=2, n_stft=65 (n_fft=128), n_mels=64, time=16
    B, n_mels, T = 2, 64, 16
    n_stft = 65
    sample_rate = 16000

    key = jax.random.PRNGKey(0)
    melspec = jax.random.uniform(key, (B, n_mels, T), dtype=jnp.float32)

    mod = InverseMelScale(n_stft=n_stft, n_mels=n_mels, sample_rate=sample_rate)
    spec = mod(melspec)
    jax.block_until_ready(spec)

    # reference check against plain JAX (min-norm lstsq solution + relu)
    ref = jnp.maximum(
        jnp.einsum(
            "fm,bmt->bft", mod.w, melspec, precision=jax.lax.Precision.HIGHEST
        ),
        0.0,
    )
    assert spec.shape == (B, n_stft, T)
    assert jnp.allclose(spec, ref, atol=1e-3, rtol=1e-3)

    print("KERNEL_OK")
</pallas_src>

<mosaic_0001>
module attributes {stable_mosaic.version = 11 : i64} {
  func.func @_inverse_melscale_kernel(%arg0: i32, %arg1: i32, %arg2: memref<1x64x128xf32, #tpu.memory_space<vmem>>, %arg3: memref<65x64xf32, #tpu.memory_space<vmem>>, %arg4: memref<1x65x128xf32, #tpu.memory_space<vmem>>) attributes {dimension_semantics = [#tpu.dimension_semantics<parallel>, #tpu.dimension_semantics<parallel>], iteration_bounds = array<i64: 2, 1>, scalar_prefetch = 0 : i64, scratch_operands = 0 : i64, tpu.core_type = #tpu.core_type<tc>, window_params = [{transform_indices = @transform_0, window_bounds = array<i64: 1, 64, 128>}, {pipeline_mode = #tpu.pipeline_mode<synchronous>, transform_indices = @transform_1, window_bounds = array<i64: 65, 64>}, {transform_indices = @transform_2, window_bounds = array<i64: 1, 65, 128>}]} {
    %c0 = arith.constant 0 : index
    %c0_0 = arith.constant 0 : index
    %0 = vector.load %arg3[%c0, %c0_0] : memref<65x64xf32, #tpu.memory_space<vmem>>, vector<65x64xf32>
    %c0_1 = arith.constant 0 : index
    %c0_2 = arith.constant 0 : index
    %c0_3 = arith.constant 0 : index
    %1 = vector.load %arg2[%c0_1, %c0_2, %c0_3] : memref<1x64x128xf32, #tpu.memory_space<vmem>>, vector<1x64x128xf32>
    %2 = vector.shape_cast %1 : vector<1x64x128xf32> to vector<64x128xf32>
    %cst = arith.constant dense<0.000000e+00> : vector<65x128xf32>
    %3 = tpu.matmul %0, %2, %cst {dimension_numbers = #tpu.dot_dimension_numbers<[1], [0], [0], [1], [0, 0, 1, 1], [], []>} : vector<65x64xf32>, vector<64x128xf32>, vector<65x128xf32> -> vector<65x128xf32>
    %cst_4 = arith.constant 0.000000e+00 : f32
    %4 = vector.broadcast %cst_4 : f32 to vector<65x128xf32>
    %5 = arith.maximumf %3, %4 : vector<65x128xf32>
    %c0_5 = arith.constant 0 : index
    %c0_6 = arith.constant 0 : index
    %c0_7 = arith.constant 0 : index
    %6 = vector.load %arg4[%c0_5, %c0_6, %c0_7] : memref<1x65x128xf32, #tpu.memory_space<vmem>>, vector<1x65x128xf32>
    %7 = vector.shape_cast %6 : vector<1x65x128xf32> to vector<65x128xf32>
    %8 = vector.shape_cast %5 : vector<65x128xf32> to vector<1x65x128xf32>
    tpu.vector_store %arg4[%c0_5, %c0_6, %c0_7], %8 {strides = array<i32>} : memref<1x65x128xf32, #tpu.memory_space<vmem>>, vector<1x65x128xf32>,
    return
  }
  func.func @transform_0(%arg0: i32, %arg1: i32) -> (i32, i32, i32) {
    %c0_i32 = arith.constant 0 : i32
    %c0_i32_0 = arith.constant 0 : i32
    return %arg0, %c0_i32, %arg1 : i32, i32, i32
  }
  func.func @transform_1(%arg0: i32, %arg1: i32) -> (i32, i32) {
    %c0_i32 = arith.constant 0 : i32
    %c0_i32_0 = arith.constant 0 : i32
    %c0_i32_1 = arith.constant 0 : i32
    return %c0_i32, %c0_i32_0 : i32, i32
  }
  func.func @transform_2(%arg0: i32, %arg1: i32) -> (i32, i32, i32) {
    %c0_i32 = arith.constant 0 : i32
    %c0_i32_0 = arith.constant 0 : i32
    return %arg0, %c0_i32, %arg1 : i32, i32, i32
  }
}

</mosaic_0001>

<bundles_post_ra>
// kernel: tpu_custom_call.1
= control target key start
LH: loop header
LB: loop body
LE: loop exit
PB: predicated region body
PF: predicated region fallthrough
CT: control target
= control target key end

     0   :  { %s601_s9 = smov 0   ;;  %s603_s10 = smov 0   ;;  %s694_s0 = inlined_call_operand.vmem [shape: f32[2,64,128], index: 0, kind: input, shape index: {}]   ;;  %s695_s1 = inlined_call_operand.vmem [shape: f32[65,64], index: 1, kind: input, shape index: {}]   ;;  %s696_s2 = inlined_call_operand.vmem [shape: f32[2,65,128], index: 2, kind: output, shape index: {}]  }
   0x1   :  { %s605_s11 = smov 0  }
   0x2 LB: > { %s24_s12 = sadd.s32 1, %s577_s10  ;;  %p435_p0 = scmp.ge.s32.totalorder %s581_s11, 1  ;;  %s581_s11 = sphi %s605_s11, %s12_s11   ;;  %s577_s10 = sphi %s603_s10, %s698_s10   ;;  %s573_s9 = sphi %s601_s9, %s697_s9  }
   0x3   : > { %p26_p1 = scmp.ge.s32.totalorder %s24_s12, 2  ;;  %p131_p2 = scmp.lt.s32.totalorder %s581_s11, 3 }
   0x5   : > { %s700_s12 = smov (%p26_p1, %s24_s12), 0  ;;  %p132_p3 = pnand %p435_p0, %p131_p2 }
   0x6   : > { %p159_p4 = scmp.lt.s32.totalorder (!%p132_p3), %s573_s9, 1  ;;  %v583_v0 = vmov (!%p132_p3), 0.0|0.0   ;;  %vm584_vm0 = vmmov (!%p132_p3), 0   ;;  %v585_v1 = vmov (!%p132_p3), 0.0   ;;  %v175_v14 = vld [vmem:[%s695_s1] sm:$0xff] (!%p132_p3)  ;;  %vm192_vm1 = vcmask (!%p132_p3), 523264  }
   0x7   : > { %135 = sbr.rel (%p132_p3) target bundleno = 266 (0x10a), region = 28  ;;  %511 = vmatprep.subr.bf16.mxu0 (!%p132_p3), %v583_v0  ;;  %523 = vmatprep.subr.bf16.mxu1 (!%p132_p3), %v583_v0  ;;  %v180_v15 = vld [vmem:[%s695_s1 + $0x28] sm:$0xff] (!%p132_p3)  ;;  %v181_v17 = vld [vmem:[%s695_s1 + $0x30] sm:$0xff] (!%p132_p3)  ;;  %v182_v19 = vld [vmem:[%s695_s1 + $0x38] sm:$0xff] (!%p132_p3) }
   0x8   : > { %484 = vmatprep.mubr.msk.f32.mxu0 (!%p132_p3), %vm584_vm0, %v585_v1  ;;  %499 = vmatprep.mubr.msk.f32.mxu1 (!%p132_p3), %vm584_vm0, %v585_v1  ;;  %v176_v16 = vld [vmem:[%s695_s1 + $0x8] sm:$0xff] (!%p132_p3)  ;;  %v177_v18 = vld [vmem:[%s695_s1 + $0x10] sm:$0xff] (!%p132_p3)  ;;  %v178_v20 = vld [vmem:[%s695_s1 + $0x18] sm:$0xff] (!%p132_p3) }
   0x9   : > { %v183_v21 = vld [vmem:[%s695_s1 + $0x40] sm:$0x1] (!%p132_p3) }
   0xa   : > { %v179_v22 = vld [vmem:[%s695_s1 + $0x20] sm:$0xff] (!%p132_p3) }
   0xe   : > { %s702_s9 = smov (!%p159_p4, %s573_s9), 1 }
   0xf   : > { %s450_s13 = sshll.u32 %s702_s9, 6  ;;  %s531_s7 = smul.u32 72, %s702_s9 }
  0x10   : > { %s166_s16 = scalar_lea.vmem %s694_s0, %s450_s13 }
  0x11   : > { %v184_v2 = vld [vmem:[%s166_s16] sm:$0xff]  ;;  %v185_v3 = vld [vmem:[%s166_s16 + $0x8] sm:$0xff]  ;;  %v186_v4 = vld [vmem:[%s166_s16 + $0x10] sm:$0xff]  ;;  %s674_s14 = scalar_lea.vmem %s696_s2, %s531_s7 }
  0x12   : > { %v512_v5 = vpack.c.bf16 %v185_v3, %v184_v2  ;;  %v187_v6 = vld [vmem:[%s166_s16 + $0x18] sm:$0xff]  ;;  %v188_v8 = vld [vmem:[%s166_s16 + $0x20] sm:$0xff]  ;;  %v189_v9 = vld [vmem:[%s166_s16 + $0x28] sm:$0xff] }
  0x13   : > { %v515_v7 = vpack.c.bf16 %v187_v6, %v186_v4  ;;  %v518_v10 = vpack.c.bf16 %v189_v9, %v188_v8  ;;  %v190_v11 = vld [vmem:[%s166_s16 + $0x30] sm:$0xff]  ;;  %v191_v12 = vld [vmem:[%s166_s16 + $0x38] sm:$0xff] }
  0x14   : > { %513 = vmatpush3.bf16.msra.mxu0 %v512_v5  ;;  %527 = vmatpush3.bf16.msra.mxu1 %v512_v5  ;;  %v521_v13 = vpack.c.bf16 %v191_v12, %v190_v11 }
  0x15   : > { %514 = vmatprep.subr.bf16.mxu0 %v583_v0  ;;  %524 = vmatprep.subr.bf16.mxu1 %v583_v0 }
  0x18   : > { %516 = vmatpush3.bf16.msra.mxu0 %v515_v7  ;;  %528 = vmatpush3.bf16.msra.mxu1 %v515_v7 }
  0x19   : > { %517 = vmatprep.subr.bf16.mxu0 %v583_v0  ;;  %525 = vmatprep.subr.bf16.mxu1 %v583_v0 }
  0x1c   : > { %519 = vmatpush3.bf16.msra.mxu0 %v518_v10  ;;  %529 = vmatpush3.bf16.msra.mxu1 %v518_v10 }
  0x1d   : > { %520 = vmatprep.subr.bf16.mxu0 %v583_v0  ;;  %526 = vmatprep.subr.bf16.mxu1 %v583_v0 }
  0x20   : > { %522 = vmatpush3.bf16.msra.mxu0 %v521_v13  ;;  %530 = vmatpush3.bf16.msra.mxu1 %v521_v13 }
  0x23   : > { %485 = vmatmul.mubr.msk.f32.vlgmr.msra.gmra.mrb[0].mxu0 %vm192_vm1, %v175_v14  ;;  %500 = vmatmul.mubr.msk.f32.vlgmr.msra.gmra.mrb[0].mxu1 %vm192_vm1, %v180_v15 }
  0x24   : > { %487 = vmatprep.mubr.msk.f32.mxu0 %vm584_vm0, %v585_v1  ;;  %502 = vmatprep.mubr.msk.f32.mxu1 %vm584_vm0, %v585_v1 }
  0x27   : > { %488 = vmatmul.mubr.msk.f32.gmra.mrb[2].mxu0 %vm192_vm1, %v176_v16  ;;  %503 = vmatmul.mubr.msk.f32.gmra.mrb[2].mxu1 %vm192_vm1, %v181_v17 }
  0x28   : > { %490 = vmatprep.mubr.msk.f32.mxu0 %vm584_vm0, %v585_v1  ;;  %505 = vmatprep.mubr.msk.f32.mxu1 %vm584_vm0, %v585_v1 }
  0x2b   : > { %491 = vmatmul.mubr.msk.f32.gmra.mrb[4].mxu0 %vm192_vm1, %v177_v18  ;;  %506 = vmatmul.mubr.msk.f32.gmra.mrb[4].mxu1 %vm192_vm1, %v182_v19 }
  0x2c   : > { %493 = vmatprep.mubr.msk.f32.mxu0 %vm584_vm0, %v585_v1  ;;  %508 = vmatprep.mubr.msk.f32.mxu1 %vm584_vm0, %v585_v1 }
  0x2f   : > { %494 = vmatmul.mubr.msk.f32.gmra.mrb[6].mxu0 %vm192_vm1, %v178_v20  ;;  %509 = vmatmul.mubr.msk.f32.gmra.mrb[6].mxu1 %vm192_vm1, %v183_v21 }
  0x30   : > { %496 = vmatprep.mubr.msk.f32.mxu0 %vm584_vm0, %v585_v1 }
  0x33   : > { %497 = vmatmul.mubr.msk.f32.gmra.mrb[8].mxu0 %vm192_vm1, %v179_v22 }
  0xf6   : > { %v286_v23 = vpop.f32.mrb[0].mxu0  ;;  %v311_v24 = vpop.f32.mrb[0].mxu1 }
  0xf7   : > { %v330_v25 = vmax.f32 %v286_v23, 0.0  ;;  %v486_v26 = vpop.f32.mrb[1].mxu0  ;;  %v335_v27 = vmax.f32 %v311_v24, 0.0  ;;  %v501_v28 = vpop.f32.mrb[1].mxu1 }
  0xf9   : > { %339 = vst [vmem:[%s674_s14] sm:$0xff] %v330_v25  ;;  %344 = vst [vmem:[%s674_s14 + $0x28] sm:$0xff] %v335_v27 }
  0xfa   : > { %v291_v29 = vpop.f32.mrb[2].mxu0  ;;  %v316_v30 = vpop.f32.mrb[2].mxu1 }
  0xfb   : > { %v331_v31 = vmax.f32 %v291_v29, 0.0  ;;  %v489_v32 = vpop.f32.mrb[3].mxu0  ;;  %v336_v33 = vmax.f32 %v316_v30, 0.0  ;;  %v504_v34 = vpop.f32.mrb[3].mxu1 }
  0xfd   : > { %340 = vst [vmem:[%s674_s14 + $0x8] sm:$0xff] %v331_v31  ;;  %345 = vst [vmem:[%s674_s14 + $0x30] sm:$0xff] %v336_v33 }
  0xfe   : > { %v296_v35 = vpop.f32.mrb[4].mxu0  ;;  %v321_v36 = vpop.f32.mrb[4].mxu1 }
  0xff   : > { %v332_v37 = vmax.f32 %v296_v35, 0.0  ;;  %v492_v38 = vpop.f32.mrb[5].mxu0  ;;  %v337_v39 = vmax.f32 %v321_v36, 0.0  ;;  %v507_v40 = vpop.f32.mrb[5].mxu1 }
 0x101   : > { %341 = vst [vmem:[%s674_s14 + $0x10] sm:$0xff] %v332_v37  ;;  %346 = vst [vmem:[%s674_s14 + $0x38] sm:$0xff] %v337_v39 }
 0x102   : > { %v301_v41 = vpop.f32.mrb[6].mxu0  ;;  %v326_v42 = vpop.f32.mrb[6].mxu1 }
 0x103   : > { %v333_v43 = vmax.f32 %v301_v41, 0.0  ;;  %v495_v44 = vpop.f32.mrb[7].mxu0  ;;  %v338_v45 = vmax.f32 %v326_v42, 0.0  ;;  %v510_v46 = vpop.f32.mrb[7].mxu1 }
 0x105   : > { %342 = vst [vmem:[%s674_s14 + $0x18] sm:$0xff] %v333_v43  ;;  %347 = vst [vmem:[%s674_s14 + $0x40] sm:$0x1] %v338_v45 }
 0x106   : > { %v306_v47 = vpop.f32.mrb[8].mxu0 }
 0x107   : > { %v334_v48 = vmax.f32 %v306_v47, 0.0  ;;  %v498_v49 = vpop.f32.mrb[9].mxu0 }
 0x109   : > { %343 = vst [vmem:[%s674_s14 + $0x20] sm:$0xff] %v334_v48 }
 0x10a PF: > { %s12_s11 = sadd.s32 1, %s581_s11   ;;  %s697_s9 = smov %s577_s10 }
 0x10b   : > { %p9_p5 = scmp.ge.s32.totalorder %s12_s11, 4   ;;  %s698_s10 = smov %s700_s12 }
 0x10d   :  { %11 = sbr.rel (!%p9_p5) target bundleno = 2 (0x2), region = 58 }

</bundles_post_ra>
